<compile_context>
chip_gen: v7x
topology: tpu7x:2x2x1
jax: 0.10.0
libtpu: 0.0.40
codegen_flags: <defaults>
</compile_context>

<pallas_src>
import functools

import jax
import jax.numpy as jnp
from jax import lax
from jax.experimental import pallas as pl
from jax.experimental.pallas import tpu as pltpu


# ------------------------------- helpers ------------------------------------

def _round_up(x, m):
    return ((x + m - 1) // m) * m


def _pad_last(a, target):
    pad = target - a.shape[-1]
    if pad > 0:
        a = jnp.pad(a, [(0, 0)] * (a.ndim - 1) + [(0, pad)])
    return a


def _pad_first(a, target):
    pad = target - a.shape[0]
    if pad > 0:
        a = jnp.pad(a, [(0, pad)] + [(0, 0)] * (a.ndim - 1))
    return a


def _leaky_relu(x, slope=0.2):
    # valid for slope in [0, 1]; 2 VALU ops instead of cmp+mul+select
    return jnp.maximum(x, slope * x)


def _bn_train_fused(h, gamma, beta, inv_n, eps):
    """Train-mode BatchNorm1d on (N, C): fused scale/shift, single-pass stats.

    inv_n = 1/true_batch_size (static python float); the batch dim is never
    padded, so statistics are exact.
    """
    s1 = jnp.sum(h, axis=0, keepdims=True)
    s2 = jnp.sum(h * h, axis=0, keepdims=True)
    mu = s1 * inv_n
    var = jnp.maximum(s2 * inv_n - mu * mu, 0.0)   # clamp tiny fp negatives
    s = gamma * lax.rsqrt(var + eps)               # (1, C)
    t = beta - mu * s                              # (1, C)
    return h * s + t


# ------------------------------- kernels ------------------------------------

def _resblock_kernel_proj(x_ref, wcat_ref, w2_ref, bn1_ref, bn2_ref, o_ref, *,
                          hid_p, final_nl, eps, n_rows, mm_dtype):
    """Fin != Fout: skip path = LeakyReLU(fc3(x)); w1|w3 merged into wcat.

    bn1 = [gamma1; beta1] (2, hid_p); bn2 = [gamma2; beta2; b3] (3, fout_p).
    """
    inv_n = 1.0 / float(n_rows)
    x = x_ref[...]
    bn1 = bn1_ref[...]
    bn2 = bn2_ref[...]

    # one matmul for both the block input projection and the skip projection
    cat = jnp.dot(x.astype(mm_dtype), wcat_ref[...],
                  preferred_element_type=jnp.float32)          # (N, hid_p+fout_p)
    h = cat[:, :hid_p]                                         # 128-aligned slice
    skip = _leaky_relu(cat[:, hid_p:] + bn2[2:3, :])

    # pre-BN Linear bias cancelled by train-mode BN -> no b1 add
    h = _leaky_relu(_bn_train_fused(h, bn1[0:1, :], bn1[1:2, :], inv_n, eps))

    y = jnp.dot(h.astype(mm_dtype), w2_ref[...],
                preferred_element_type=jnp.float32)
    y = _bn_train_fused(y, bn2[0:1, :], bn2[1:2, :], inv_n, eps)

    out = skip + y
    if final_nl:
        out = _leaky_relu(out)
    o_ref[...] = out.astype(o_ref.dtype)


def _resblock_kernel_identity(x_ref, w1_ref, w2_ref, bn1_ref, bn2_ref, o_ref, *,
                              final_nl, eps, n_rows, mm_dtype):
    """Fin == Fout: identity skip (x already lane-padded in the wrapper).

    bn1 = [gamma1; beta1] (2, hid_p); bn2 = [gamma2; beta2] (2, fout_p).
    """
    inv_n = 1.0 / float(n_rows)
    x = x_ref[...]
    bn1 = bn1_ref[...]
    bn2 = bn2_ref[...]

    h = jnp.dot(x.astype(mm_dtype), w1_ref[...],
                preferred_element_type=jnp.float32)
    h = _leaky_relu(_bn_train_fused(h, bn1[0:1, :], bn1[1:2, :], inv_n, eps))

    y = jnp.dot(h.astype(mm_dtype), w2_ref[...],
                preferred_element_type=jnp.float32)
    y = _bn_train_fused(y, bn2[0:1, :], bn2[1:2, :], inv_n, eps)

    out = x + y
    if final_nl:
        out = _leaky_relu(out)
    o_ref[...] = out.astype(o_ref.dtype)


# --------------------------- parameter preparation ---------------------------

def init_resblock_params(key, Fin, Fout, hid_dim=256, dtype=jnp.float32):
    """Deterministic synthetic parameters (Linear weights stored as (in, out))."""
    ks = jax.random.split(key, 6)
    p = {
        "w1": jax.random.normal(ks[0], (Fin, hid_dim), dtype) * (1.0 / jnp.sqrt(Fin)),
        "b1": jax.random.normal(ks[1], (1, hid_dim), dtype) * 0.01,
        "g1": jnp.ones((1, hid_dim), dtype),
        "be1": jnp.zeros((1, hid_dim), dtype),
        "w2": jax.random.normal(ks[2], (hid_dim, Fout), dtype) * (1.0 / jnp.sqrt(hid_dim)),
        "b2": jax.random.normal(ks[3], (1, Fout), dtype) * 0.01,
        "g2": jnp.ones((1, Fout), dtype),
        "be2": jnp.zeros((1, Fout), dtype),
    }
    if Fin != Fout:
        p["w3"] = jax.random.normal(ks[4], (Fin, Fout), dtype) * (1.0 / jnp.sqrt(Fin))
        p["b3"] = jax.random.normal(ks[5], (1, Fout), dtype) * 0.01
    return p


def prepare_resblock_params(params, *, use_bf16_matmul=False):
    """One-time preprocessing: lane padding, w1|w3 merge, vector packing, casts.

    Returns a dict of device arrays + static metadata; pass it to
    resblock_forward repeatedly without re-doing any of this work.
    """
    Fin, hid = params["w1"].shape
    Fout = params["w2"].shape[1]
    has_proj = "w3" in params
    hid_p = _round_up(hid, 128)
    fout_p = _round_up(Fout, 128)
    mm_dtype = jnp.bfloat16 if use_bf16_matmul else jnp.float32
    f32 = jnp.float32

    g1 = _pad_last(params["g1"].reshape(1, -1).astype(f32), hid_p)
    be1 = _pad_last(params["be1"].reshape(1, -1).astype(f32), hid_p)
    g2 = _pad_last(params["g2"].reshape(1, -1).astype(f32), fout_p)
    be2 = _pad_last(params["be2"].reshape(1, -1).astype(f32), fout_p)

    w2 = _pad_first(_pad_last(params["w2"].astype(f32), fout_p), hid_p).astype(mm_dtype)

    prepared = {
        "Fin": Fin, "Fout": Fout, "hid_p": hid_p, "fout_p": fout_p,
        "has_proj": has_proj, "mm_dtype": mm_dtype,
        "bn1": jnp.concatenate([g1, be1], axis=0),       # (2, hid_p)
        "w2": w2,
    }
    if has_proj:
        # merge w1 (Fin, hid_p) and w3 (Fin, fout_p) -> single x-side matmul
        w1 = _pad_last(params["w1"].astype(f32), hid_p)
        w3 = _pad_last(params["w3"].astype(f32), fout_p)
        prepared["wcat"] = jnp.concatenate([w1, w3], axis=1).astype(mm_dtype)
        b3 = _pad_last(params["b3"].reshape(1, -1).astype(f32), fout_p)
        prepared["bn2"] = jnp.concatenate([g2, be2, b3], axis=0)   # (3, fout_p)
    else:
        fin_p = fout_p                                   # Fin == Fout
        prepared["fin_p"] = fin_p
        prepared["w1"] = _pad_first(_pad_last(params["w1"].astype(f32), hid_p),
                                    fin_p).astype(mm_dtype)
        prepared["bn2"] = jnp.concatenate([g2, be2], axis=0)       # (2, fout_p)
    # materialize once on device
    return {k: (jax.device_put(v) if isinstance(v, jnp.ndarray) else v)
            for k, v in prepared.items()}


# ------------------------------- forward ------------------------------------

def resblock_forward(x, prepared, *, final_nl=True, eps=1e-5, return_padded=False):
    """Pallas ResBlock forward. x: (N, Fin) float32 -> (N, Fout) [or (N, fout_p)]."""
    assert eps > 0.0, "eps must be > 0 (padded lanes rely on rsqrt(eps) finite)"
    x = jnp.asarray(x, jnp.float32)
    N, Fin = x.shape
    assert Fin == prepared["Fin"], "x feature dim mismatch"
    # NOTE: N (and eps) are baked statically; a new N changes x's shape and
    # already forces a fresh compile, so this adds no recompilation churn.

    hid_p, fout_p = prepared["hid_p"], prepared["fout_p"]
    mm_dtype = prepared["mm_dtype"]

    if prepared["has_proj"]:
        kernel = functools.partial(_resblock_kernel_proj, hid_p=hid_p,
                                   final_nl=final_nl, eps=eps, n_rows=N,
                                   mm_dtype=mm_dtype)
        args = (x, prepared["wcat"], prepared["w2"],
                prepared["bn1"], prepared["bn2"])
        flops = 2 * N * (Fin * (hid_p + fout_p) + hid_p * fout_p)
    else:
        fin_p = prepared["fin_p"]
        x_in = _pad_last(x, fin_p)           # padded cols are 0 -> skip stays 0
        kernel = functools.partial(_resblock_kernel_identity,
                                   final_nl=final_nl, eps=eps, n_rows=N,
                                   mm_dtype=mm_dtype)
        args = (x_in, prepared["w1"], prepared["w2"],
                prepared["bn1"], prepared["bn2"])
        flops = 2 * N * (fin_p * hid_p + hid_p * fout_p)

    bytes_accessed = sum(int(a.size) * a.dtype.itemsize for a in args) + N * fout_p * 4
    cost = pl.CostEstimate(flops=flops, transcendentals=hid_p + fout_p,
                           bytes_accessed=bytes_accessed)

    vmem = pl.BlockSpec(memory_space=pltpu.MemorySpace.VMEM)
    out_p = pl.pallas_call(
        kernel,
        out_shape=jax.ShapeDtypeStruct((N, fout_p), jnp.float32),
        in_specs=[vmem] * len(args),
        out_specs=vmem,
        cost_estimate=cost,
    )(*args)
    if return_padded:
        return out_p                          # (N, fout_p); padded lanes are 0
    return out_p[:, :prepared["Fout"]]


# ------------------------------- reference ----------------------------------

def _resblock_reference(x, params, *, final_nl=True, eps=1e-5):
    """Pure-JAX reference (keeps the pre-BN biases; kernel drops them since
    train-mode BN cancels them exactly)."""
    def bn(h, g, b):
        mu = h.mean(0, keepdims=True)
        var = ((h - mu) ** 2).mean(0, keepdims=True)
        return (h - mu) / jnp.sqrt(var + eps) * g + b

    def lrelu(v):
        return jnp.where(v >= 0, v, 0.2 * v)

    h = x @ params["w1"] + params["b1"]
    h = lrelu(bn(h, params["g1"], params["be1"]))
    y = bn(h @ params["w2"] + params["b2"], params["g2"], params["be2"])
    skip = lrelu(x @ params["w3"] + params["b3"]) if "w3" in params else x
    out = skip + y
    return lrelu(out) if final_nl else out


# --------------------------------- main -------------------------------------

if __name__ == "__main__":
    key = jax.random.PRNGKey(0)
    kx, kp1, kp2 = jax.random.split(key, 3)

    # projection-skip variant (Fin != Fout)
    N, Fin, Fout, hid = 8, 32, 64, 256
    x = jax.random.normal(kx, (N, Fin), jnp.float32)
    params = init_resblock_params(kp1, Fin, Fout, hid_dim=hid)
    prepared = prepare_resblock_params(params)           # one-time preprocessing
    out = jax.block_until_ready(resblock_forward(x, prepared, final_nl=True))
    ref = _resblock_reference(x, params, final_nl=True)
    assert out.shape == (N, Fout)
    assert jnp.allclose(out, ref, atol=1e-4, rtol=1e-4), "proj variant mismatch"

    # padded output path (no post-call slice) must match on the real lanes
    out_pad = jax.block_until_ready(
        resblock_forward(x, prepared, final_nl=True, return_padded=True))
    assert out_pad.shape == (N, prepared["fout_p"])
    assert jnp.allclose(out_pad[:, :Fout], ref, atol=1e-4, rtol=1e-4)

    # identity-skip variant (Fin == Fout)
    params_id = init_resblock_params(kp2, Fout, Fout, hid_dim=hid)
    prepared_id = prepare_resblock_params(params_id)
    x2 = x @ params["w3"]  # any (N, Fout) input
    out2 = jax.block_until_ready(resblock_forward(x2, prepared_id, final_nl=False))
    ref2 = _resblock_reference(x2, params_id, final_nl=False)
    assert out2.shape == (N, Fout)
    assert jnp.allclose(out2, ref2, atol=1e-4, rtol=1e-4), "identity variant mismatch"

    print("KERNEL_OK")
</pallas_src>

<mosaic_0001>
module attributes {stable_mosaic.version = 11 : i64} {
  func.func @_resblock_kernel_proj(%arg0: memref<8x32xf32, #tpu.memory_space<vmem>>, %arg1: memref<32x384xf32, #tpu.memory_space<vmem>>, %arg2: memref<256x128xf32, #tpu.memory_space<vmem>>, %arg3: memref<2x256xf32, #tpu.memory_space<vmem>>, %arg4: memref<3x128xf32, #tpu.memory_space<vmem>>, %arg5: memref<8x128xf32, #tpu.memory_space<vmem>>) attributes {dimension_semantics = [], scalar_prefetch = 0 : i64, scratch_operands = 0 : i64, tpu.core_type = #tpu.core_type<tc>} {
    %c0 = arith.constant 0 : index
    %c0_0 = arith.constant 0 : index
    %0 = vector.load %arg0[%c0, %c0_0] : memref<8x32xf32, #tpu.memory_space<vmem>>, vector<8x32xf32>
    %c0_1 = arith.constant 0 : index
    %c0_2 = arith.constant 0 : index
    %1 = vector.load %arg3[%c0_1, %c0_2] : memref<2x256xf32, #tpu.memory_space<vmem>>, vector<2x256xf32>
    %c0_3 = arith.constant 0 : index
    %c0_4 = arith.constant 0 : index
    %2 = vector.load %arg4[%c0_3, %c0_4] : memref<3x128xf32, #tpu.memory_space<vmem>>, vector<3x128xf32>
    %c0_5 = arith.constant 0 : index
    %c0_6 = arith.constant 0 : index
    %3 = vector.load %arg1[%c0_5, %c0_6] : memref<32x384xf32, #tpu.memory_space<vmem>>, vector<32x384xf32>
    %cst = arith.constant dense<0.000000e+00> : vector<8x384xf32>
    %4 = tpu.matmul %0, %3, %cst {dimension_numbers = #tpu.dot_dimension_numbers<[1], [0], [0], [1], [0, 0, 1, 1], [], []>} : vector<8x32xf32>, vector<32x384xf32>, vector<8x384xf32> -> vector<8x384xf32>
    %5 = vector.extract_strided_slice %4 {offsets = [0, 0], sizes = [8, 256], strides = [1, 1]} : vector<8x384xf32> to vector<8x256xf32>
    %6 = vector.extract_strided_slice %4 {offsets = [0, 256], sizes = [8, 128], strides = [1, 1]} : vector<8x384xf32> to vector<8x128xf32>
    %7 = vector.extract_strided_slice %2 {offsets = [2, 0], sizes = [1, 128], strides = [1, 1]} : vector<3x128xf32> to vector<1x128xf32>
    %8 = vector.broadcast %7 : vector<1x128xf32> to vector<8x128xf32>
    %9 = arith.addf %6, %8 : vector<8x128xf32>
    %cst_7 = arith.constant 2.000000e-01 : f32
    %10 = vector.broadcast %cst_7 : f32 to vector<8x128xf32>
    %11 = arith.mulf %10, %9 : vector<8x128xf32>
    %12 = arith.maximumf %9, %11 : vector<8x128xf32>
    %13 = vector.extract_strided_slice %1 {offsets = [0, 0], sizes = [1, 256], strides = [1, 1]} : vector<2x256xf32> to vector<1x256xf32>
    %14 = vector.extract_strided_slice %1 {offsets = [1, 0], sizes = [1, 256], strides = [1, 1]} : vector<2x256xf32> to vector<1x256xf32>
    %cst_8 = arith.constant dense<0.000000e+00> : vector<256xf32>
    %15 = vector.multi_reduction <add>, %5, %cst_8 [0] : vector<8x256xf32> to vector<256xf32>
    %16 = vector.shape_cast %15 : vector<256xf32> to vector<1x256xf32>
    %17 = arith.mulf %5, %5 : vector<8x256xf32>
    %cst_9 = arith.constant dense<0.000000e+00> : vector<256xf32>
    %18 = vector.multi_reduction <add>, %17, %cst_9 [0] : vector<8x256xf32> to vector<256xf32>
    %19 = vector.shape_cast %18 : vector<256xf32> to vector<1x256xf32>
    %cst_10 = arith.constant 1.250000e-01 : f32
    %20 = vector.broadcast %cst_10 : f32 to vector<1x256xf32>
    %21 = arith.mulf %16, %20 : vector<1x256xf32>
    %cst_11 = arith.constant 1.250000e-01 : f32
    %22 = vector.broadcast %cst_11 : f32 to vector<1x256xf32>
    %23 = arith.mulf %19, %22 : vector<1x256xf32>
    %24 = arith.mulf %21, %21 : vector<1x256xf32>
    %25 = arith.subf %23, %24 : vector<1x256xf32>
    %cst_12 = arith.constant 0.000000e+00 : f32
    %26 = vector.broadcast %cst_12 : f32 to vector<1x256xf32>
    %27 = arith.maximumf %25, %26 : vector<1x256xf32>
    %cst_13 = arith.constant 9.99999974E-6 : f32
    %28 = vector.broadcast %cst_13 : f32 to vector<1x256xf32>
    %29 = arith.addf %27, %28 : vector<1x256xf32>
    %30 = math.rsqrt %29 : vector<1x256xf32>
    %31 = arith.mulf %13, %30 : vector<1x256xf32>
    %32 = arith.mulf %21, %31 : vector<1x256xf32>
    %33 = arith.subf %14, %32 : vector<1x256xf32>
    %34 = vector.broadcast %31 : vector<1x256xf32> to vector<8x256xf32>
    %35 = arith.mulf %5, %34 : vector<8x256xf32>
    %36 = vector.broadcast %33 : vector<1x256xf32> to vector<8x256xf32>
    %37 = arith.addf %35, %36 : vector<8x256xf32>
    %cst_14 = arith.constant 2.000000e-01 : f32
    %38 = vector.broadcast %cst_14 : f32 to vector<8x256xf32>
    %39 = arith.mulf %38, %37 : vector<8x256xf32>
    %40 = arith.maximumf %37, %39 : vector<8x256xf32>
    %c0_15 = arith.constant 0 : index
    %c0_16 = arith.constant 0 : index
    %41 = vector.load %arg2[%c0_15, %c0_16] : memref<256x128xf32, #tpu.memory_space<vmem>>, vector<256x128xf32>
    %cst_17 = arith.constant dense<0.000000e+00> : vector<8x128xf32>
    %42 = tpu.matmul %40, %41, %cst_17 {dimension_numbers = #tpu.dot_dimension_numbers<[1], [0], [0], [1], [0, 0, 1, 1], [], []>} : vector<8x256xf32>, vector<256x128xf32>, vector<8x128xf32> -> vector<8x128xf32>
    %43 = vector.extract_strided_slice %2 {offsets = [0, 0], sizes = [1, 128], strides = [1, 1]} : vector<3x128xf32> to vector<1x128xf32>
    %44 = vector.extract_strided_slice %2 {offsets = [1, 0], sizes = [1, 128], strides = [1, 1]} : vector<3x128xf32> to vector<1x128xf32>
    %cst_18 = arith.constant dense<0.000000e+00> : vector<128xf32>
    %45 = vector.multi_reduction <add>, %42, %cst_18 [0] : vector<8x128xf32> to vector<128xf32>
    %46 = vector.shape_cast %45 : vector<128xf32> to vector<1x128xf32>
    %47 = arith.mulf %42, %42 : vector<8x128xf32>
    %cst_19 = arith.constant dense<0.000000e+00> : vector<128xf32>
    %48 = vector.multi_reduction <add>, %47, %cst_19 [0] : vector<8x128xf32> to vector<128xf32>
    %49 = vector.shape_cast %48 : vector<128xf32> to vector<1x128xf32>
    %cst_20 = arith.constant 1.250000e-01 : f32
    %50 = vector.broadcast %cst_20 : f32 to vector<1x128xf32>
    %51 = arith.mulf %46, %50 : vector<1x128xf32>
    %cst_21 = arith.constant 1.250000e-01 : f32
    %52 = vector.broadcast %cst_21 : f32 to vector<1x128xf32>
    %53 = arith.mulf %49, %52 : vector<1x128xf32>
    %54 = arith.mulf %51, %51 : vector<1x128xf32>
    %55 = arith.subf %53, %54 : vector<1x128xf32>
    %cst_22 = arith.constant 0.000000e+00 : f32
    %56 = vector.broadcast %cst_22 : f32 to vector<1x128xf32>
    %57 = arith.maximumf %55, %56 : vector<1x128xf32>
    %cst_23 = arith.constant 9.99999974E-6 : f32
    %58 = vector.broadcast %cst_23 : f32 to vector<1x128xf32>
    %59 = arith.addf %57, %58 : vector<1x128xf32>
    %60 = math.rsqrt %59 : vector<1x128xf32>
    %61 = arith.mulf %43, %60 : vector<1x128xf32>
    %62 = arith.mulf %51, %61 : vector<1x128xf32>
    %63 = arith.subf %44, %62 : vector<1x128xf32>
    %64 = vector.broadcast %61 : vector<1x128xf32> to vector<8x128xf32>
    %65 = arith.mulf %42, %64 : vector<8x128xf32>
    %66 = vector.broadcast %63 : vector<1x128xf32> to vector<8x128xf32>
    %67 = arith.addf %65, %66 : vector<8x128xf32>
    %68 = arith.addf %12, %67 : vector<8x128xf32>
    %cst_24 = arith.constant 2.000000e-01 : f32
    %69 = vector.broadcast %cst_24 : f32 to vector<8x128xf32>
    %70 = arith.mulf %69, %68 : vector<8x128xf32>
    %71 = arith.maximumf %68, %70 : vector<8x128xf32>
    %c0_25 = arith.constant 0 : index
    %c0_26 = arith.constant 0 : index
    %72 = vector.load %arg5[%c0_25, %c0_26] : memref<8x128xf32, #tpu.memory_space<vmem>>, vector<8x128xf32>
    tpu.vector_store %arg5[%c0_25, %c0_26], %71 {strides = array<i32>} : memref<8x128xf32, #tpu.memory_space<vmem>>, vector<8x128xf32>,
    return
  }
}

</mosaic_0001>

<bundles_post_ra>
// kernel: tpu_custom_call.1
= control target key start
LH: loop header
LB: loop body
LE: loop exit
PB: predicated region body
PF: predicated region fallthrough
CT: control target
= control target key end

     0   :  { %10 = vsyncpa [#allocation3], 0  ;;  %s833_s0 = inlined_call_operand.hbm [shape: f32[8,32], index: 0, kind: input, shape index: {}]   ;;  %s834_s1 = inlined_call_operand.hbm [shape: f32[32,384], index: 1, kind: input, shape index: {}]   ;;  %s835_s2 = inlined_call_operand.hbm [shape: f32[256,128], index: 2, kind: input, shape index: {}]   ;;  %s836_s3 = inlined_call_operand.vmem [shape: f32[2,256], index: 3, kind: input, shape index: {}]   ;;  %s837_s4 = inlined_call_operand.vmem [shape: f32[3,128], index: 4, kind: input, shape index: {}]   ;;  %s838_s5 = inlined_call_operand.hbm [shape: f32[8,128], index: 5, kind: output, shape index: {}]  }
   0x1   :  { %11 = vsyncpa [#allocation6], 0 }
   0x2   :  { %12 = vsyncpa [#allocation4], 0  ;;  %s709_s18 = smov [#allocation5]   ;;  %s615_s22 = scalar_lea.hbm %s834_s1, 1536 }
   0x3   :  { %s28_s19 = sshll.u32 %s709_s18, 4  ;;  %p616_p0 = scmp.ne.s32.totalorder %s834_s1, %s615_s22  ;;  %s29_s19 = int_to_ptr.vmem [resolvable:$true] %s28_s19 }
   0x4   :  { %p619_p1 = scmp.lt.u32.totalorder %s615_s22, %s834_s1 }
   0x6   :  { %p621_p2 = pnand %p619_p1, %p616_p0 }
   0x8   :  { %624 = shalt.err (!%p621_p2)
}
   0x9   :  { %s625_s27 = scalar_lea.vmem %s29_s19, 1536  ;;  %p630_p4 = scmp.lt.s32.totalorder %s29_s19, %s29_s19 }
   0xa   :  { %p626_p3 = scmp.ne.s32.totalorder %s29_s19, %s625_s27  ;;  %p631_p5 = scmp.lt.s32.totalorder %s625_s27, %s625_s27 }
   0xc   :  { %p632_p6 = por %p631_p5, %p630_p4 }
   0xe   :  { %p633_p7 = pnand %p632_p6, %p626_p3 }
  0x10   :  { %636 = shalt.err (!%p633_p7)
}
  0x11   :  { %s710_s28 = smov 384   ;;  %s711_s29 = smov 24  }
  0x12   :  { %34 = dma.hbm_to_vmem [thread:$0]  %s834_s1, 1536, %s29_s19, [#allocation6], %s710_s28, %s710_s28, %s711_s29  }
  0x13   :  { %s712_s7 = smov [#allocation2]   ;;  %s713_s9 = smov [#allocation7]  }
  0x14   :  { %s19_s8 = sshll.u32 %s712_s7, 4  ;;  %s40_s10 = sshll.u32 %s713_s9, 4  ;;  %s20_s8 = int_to_ptr.vmem [resolvable:$true] %s19_s8  ;;  %s41_s10 = int_to_ptr.vmem [resolvable:$true] %s40_s10 }
  0x15   :  { %s637_s13 = scalar_lea.hbm %s833_s0, 128 }
  0x16   :  { %p638_p8 = scmp.ne.s32.totalorder %s833_s0, %s637_s13  ;;  %p641_p9 = scmp.lt.u32.totalorder %s637_s13, %s833_s0 }
  0x18   :  { %p643_p10 = pnand %p641_p9, %p638_p8 }
  0x1a   :  { %646 = shalt.err (!%p643_p10)
}
  0x1b   :  { %s647_s1 = scalar_lea.vmem %s20_s8, 128  ;;  %p652_p12 = scmp.lt.s32.totalorder %s20_s8, %s20_s8 }
  0x1c   :  { %p648_p11 = scmp.ne.s32.totalorder %s20_s8, %s647_s1  ;;  %p653_p13 = scmp.lt.s32.totalorder %s647_s1, %s647_s1 }
  0x1e   :  { %p654_p0 = por %p653_p13, %p652_p12 }
  0x20   :  { %p655_p1 = pnand %p654_p0, %p648_p11 }
  0x22   :  { %658 = shalt.err (!%p655_p1)
}
  0x23   :  { %22 = dma.hbm_to_vmem [thread:$0]  %s833_s0, 128, %s20_s8, [#allocation3]  }
  0x24   :  { %s659_s22 = scalar_lea.hbm %s835_s2, 4096 }
  0x25   :  { %p660_p2 = scmp.ne.s32.totalorder %s835_s2, %s659_s22  ;;  %p663_p3 = scmp.lt.u32.totalorder %s659_s22, %s835_s2 }
  0x27   :  { %p665_p4 = pnand %p663_p3, %p660_p2 }
  0x29   :  { %668 = shalt.err (!%p665_p4)
}
  0x2a   :  { %s669_s27 = scalar_lea.vmem %s41_s10, 4096  ;;  %p674_p6 = scmp.lt.s32.totalorder %s41_s10, %s41_s10 }
  0x2b   :  { %p670_p5 = scmp.ne.s32.totalorder %s41_s10, %s669_s27  ;;  %p675_p7 = scmp.lt.s32.totalorder %s669_s27, %s669_s27 }
  0x2d   :  { %p676_p8 = por %p675_p7, %p674_p6 }
  0x2f   :  { %p677_p9 = pnand %p676_p8, %p670_p5 }
  0x31   :  { %680 = shalt.err (!%p677_p9)
}
  0x32   :  { %s714_s0 = smov 128   ;;  %s715_s28 = smov 8  }
  0x33   :  { %46 = dma.hbm_to_vmem [thread:$0]  %s835_s2, 4096, %s41_s10, [#allocation6], %s714_s0, %s714_s0, %s715_s28  }
  0x34   :  { %703 = dma.done.wait [#allocation3], 128  }
  0x35   :  { %704 = vsyncadd [#allocation3], 4294967168 }
  0x36   :  { %705 = dma.done.wait [#allocation6], 5632  }
  0x37   :  { %706 = vsyncadd [#allocation6], 4294961664  ;;  %v716_v0 = vmov 0.0   ;;  %v64_v1 = vld [vmem:[#allocation5 + $0x8] sm:$0xff]  ;;  %v67_v2 = vld [vmem:[#allocation5 + $0x20] sm:$0xff]  ;;  %vm75_vm0 = vcmask 261120  }
  0x38   :  { %143 = vmatprep.mubr.f32.mxu1 %v716_v0  ;;  %v63_v3 = vld [vmem:[#allocation5] sm:$0xff]  ;;  %v551_v4 = vpack.c.bf16 %v67_v2, %v64_v1  ;;  %v66_v5 = vld [vmem:[#allocation5 + $0x18] sm:$0xff]  ;;  %v73_v7 = vld [vmem:[#allocation5 + $0x50] sm:$0xff]  ;;  %v717_v2 = vmov 0.0|0.0   ;;  %vm718_vm1 = vmmov 0   ;;  %s720_s8 = smov [#allocation8]  }
  0x39   :  { %v70_v6 = vld [vmem:[#allocation5 + $0x38] sm:$0xff]  ;;  %v553_v8 = vpack.c.bf16 %v66_v5, %v63_v3  ;;  %v69_v10 = vld [vmem:[#allocation5 + $0x30] sm:$0xff]  ;;  %v72_v11 = vld [vmem:[#allocation5 + $0x48] sm:$0xff]  ;;  %s488_s9 = sshll.u32 %s720_s8, 4  ;;  %s489_s9 = int_to_ptr.vmem [resolvable:$true] %s488_s9 }
  0x3a   :  { %v555_v9 = vpack.c.bf16 %v73_v7, %v70_v6  ;;  %552 = vmatprep.subr.bf16.mxu1 %v551_v4  ;;  %v557_v12 = vpack.c.bf16 %v72_v11, %v69_v10  ;;  %v788_v13 = vld [vmem:[#allocation2] sm:$0xff]  ;;  %v356_v14 = vld [vmem:[#allocation7 + $0x80] sm:$0xff]  ;;  %v357_v15 = vld [vmem:[#allocation7 + $0x88] sm:$0xff]  ;;  %p686_p11 = scmp.lt.s32.totalorder %s489_s9, %s489_s9 }
  0x3b   :  { %554 = vmatpush1.bf16.msra.mxu1 %v553_v8  ;;  %v340_v16 = vld [vmem:[#allocation7] sm:$0xff]  ;;  %v565_v17 = vpack.c.bf16 %v357_v15, %v356_v14  ;;  %v341_v18 = vld [vmem:[#allocation7 + $0x8] sm:$0xff]  ;;  %v358_v19 = vld [vmem:[#allocation7 + $0x90] sm:$0xff] }
  0x3c   :  { %556 = vmatprep.subr.bf16.mxu1 %v555_v9  ;;  %v359_v20 = vld [vmem:[#allocation7 + $0x98] sm:$0xff]  ;;  %v567_v21 = vpack.c.bf16 %v341_v18, %v340_v16  ;;  %v342_v23 = vld [vmem:[#allocation7 + $0x10] sm:$0xff]  ;;  %v360_v25 = vld [vmem:[#allocation7 + $0xa0] sm:$0xff] }
  0x3d   :  { %v569_v22 = vpack.c.bf16 %v359_v20, %v358_v19  ;;  %v343_v24 = vld [vmem:[#allocation7 + $0x18] sm:$0xff]  ;;  %566 = vmatprep.subr.bf16.mxu0 %v565_v17  ;;  %v361_v26 = vld [vmem:[#allocation7 + $0xa8] sm:$0xff]  ;;  %v344_v29 = vld [vmem:[#allocation7 + $0x20] sm:$0xff] }
  0x3e   :  { %568 = vmatpush3.bf16.msra.mxu0 %v567_v21  ;;  %v571_v27 = vpack.c.bf16 %v343_v24, %v342_v23  ;;  %v573_v28 = vpack.c.bf16 %v361_v26, %v360_v25  ;;  %v345_v30 = vld [vmem:[#allocation7 + $0x28] sm:$0xff]  ;;  %v362_v31 = vld [vmem:[#allocation7 + $0xb0] sm:$0xff]  ;;  %v363_v32 = vld [vmem:[#allocation7 + $0xb8] sm:$0xff] }
  0x3f   :  { %558 = vmatpush1.bf16.msra.mxu1 %v557_v12  ;;  %570 = vmatprep.subr.bf16.mxu0 %v569_v22  ;;  %v575_v33 = vpack.c.bf16 %v345_v30, %v344_v29  ;;  %v577_v34 = vpack.c.bf16 %v363_v32, %v362_v31  ;;  %v346_v35 = vld [vmem:[#allocation7 + $0x30] sm:$0xff]  ;;  %v347_v36 = vld [vmem:[#allocation7 + $0x38] sm:$0xff]  ;;  %v364_v37 = vld [vmem:[#allocation7 + $0xc0] sm:$0xff] }
  0x40   :  { %v365_v38 = vld [vmem:[#allocation7 + $0xc8] sm:$0xff]  ;;  %v579_v39 = vpack.c.bf16 %v347_v36, %v346_v35  ;;  %v348_v41 = vld [vmem:[#allocation7 + $0x40] sm:$0xff]  ;;  %v366_v43 = vld [vmem:[#allocation7 + $0xd0] sm:$0xff]  ;;  %559 = vmatprep.subr.bf16.mxu1 %v717_v2 }
  0x41   :  { %v581_v40 = vpack.c.bf16 %v365_v38, %v364_v37  ;;  %v349_v42 = vld [vmem:[#allocation7 + $0x48] sm:$0xff]  ;;  %v367_v44 = vld [vmem:[#allocation7 + $0xd8] sm:$0xff]  ;;  %v350_v47 = vld [vmem:[#allocation7 + $0x50] sm:$0xff] }
  0x42   :  { %498 = vmatmul.mubr.msk.f32.vlgmr.msra.gmra.mrb[0].mxu1 %vm75_vm0, %v788_v13  ;;  %572 = vmatpush3.bf16.msra.mxu0 %v571_v27  ;;  %v583_v45 = vpack.c.bf16 %v349_v42, %v348_v41  ;;  %v585_v46 = vpack.c.bf16 %v367_v44, %v366_v43  ;;  %v351_v48 = vld [vmem:[#allocation7 + $0x58] sm:$0xff]  ;;  %v368_v49 = vld [vmem:[#allocation7 + $0xe0] sm:$0xff]  ;;  %v369_v50 = vld [vmem:[#allocation7 + $0xe8] sm:$0xff] }
  0x43   :  { %574 = vmatprep.subr.bf16.mxu0 %v573_v28  ;;  %v587_v51 = vpack.c.bf16 %v351_v48, %v350_v47  ;;  %v589_v52 = vpack.c.bf16 %v369_v50, %v368_v49  ;;  %v352_v53 = vld [vmem:[#allocation7 + $0x60] sm:$0xff]  ;;  %v353_v54 = vld [vmem:[#allocation7 + $0x68] sm:$0xff]  ;;  %v370_v55 = vld [vmem:[#allocation7 + $0xf0] sm:$0xff]  ;;  %548 = vmatprep.mubr.msk.f32.mxu1 %vm718_vm1, %v716_v0 }
  0x44   :  { %v371_v56 = vld [vmem:[#allocation7 + $0xf8] sm:$0xff]  ;;  %v591_v57 = vpack.c.bf16 %v353_v54, %v352_v53  ;;  %v354_v59 = vld [vmem:[#allocation7 + $0x70] sm:$0xff]  ;;  %v68_v63 = vld [vmem:[#allocation5 + $0x28] sm:$0xff] }
  0x45   :  { %v593_v58 = vpack.c.bf16 %v371_v56, %v370_v55  ;;  %v355_v60 = vld [vmem:[#allocation7 + $0x78] sm:$0xff]  ;;  %v65_v62 = vld [vmem:[#allocation5 + $0x10] sm:$0xff]  ;;  %v71_v1 = vld [vmem:[#allocation5 + $0x40] sm:$0xff] }
  0x46   :  { %576 = vmatpush3.bf16.msra.mxu0 %v575_v33  ;;  %v595_v61 = vpack.c.bf16 %v355_v60, %v354_v59  ;;  %v560_v3 = vpack.c.bf16 %v68_v63, %v65_v62  ;;  %v74_v4 = vld [vmem:[#allocation5 + $0x58] sm:$0xff] }
  0x47   :  { %578 = vmatprep.subr.bf16.mxu0 %v577_v34  ;;  %v563_v5 = vpack.c.bf16 %v74_v4, %v71_v1  ;;  %v61_v54 = vld [vmem:[%s836_s3] sm:$0xf] }
  0x48   :  { %561 = vmatpush3.bf16.msra.mxu1 %v560_v3 }
  0x49   :  { %562 = vmatprep.subr.bf16.mxu1 %v717_v2 }
  0x4a   :  { %580 = vmatpush3.bf16.msra.mxu0 %v579_v39 }
  0x4b   :  { %582 = vmatprep.subr.bf16.mxu0 %v581_v40 }
  0x4c   :  { %564 = vmatpush3.bf16.msra.mxu1 %v563_v5 }
  0x4e   :  { %584 = vmatpush3.bf16.msra.mxu0 %v583_v45  ;;  %v220_v45 = vlaneseq }
  0x4f   :  { %586 = vmatprep.subr.bf16.mxu0 %v585_v46  ;;  %549 = vmatmul.mubr.msk.f32.vlgmr.msra.gmra.mrb[2].mxu1 %vm75_vm0, %v788_v13  ;;  %v719_v46 = vmov 1983009808  }
  0x50   :  { %v271_v47 = vunpack.c.l.s4 %v719_v46  ;;  %v801_v48 = vshrl.u32 %v220_v45, 7 }
  0x52   :  { %588 = vmatpush3.bf16.msra.mxu0 %v587_v51  ;;  %v272_v49 = vunpack.c.0.s8 %v271_v47  ;;  %v222_v55 = vsub.s32 2, %v801_v48 }
  0x53   :  { %590 = vmatprep.subr.bf16.mxu0 %v589_v52 }
  0x54   :  { %v275_v51 = vsub.s32 %v272_v49, %v801_v48 }
  0x56   :  { %592 = vmatpush3.bf16.msra.mxu0 %v591_v57  ;;  %v809_v57 = vsub.s32 0, %v801_v48 }
  0x57   :  { %594 = vmatprep.subr.bf16.mxu0 %v593_v58 }
  0x5a   :  { %596 = vmatpush3.bf16.msra.mxu0 %v595_v61 }
 0x115   :  { %v795_v6 = vpop.f32.mrb[0].mxu1 }
 0x116   :  { %v227_v7 = vrot.slane %v795_v6, 4  ;;  %v239_v8 = vmul.f32 %v795_v6, %v795_v6  ;;  %v147_v9 = vpop.f32.mrb[1].mxu1 }
 0x117   :  { %v233_v10 = vrot.slane %v147_v9, 4  ;;  %v240_v11 = vmul.f32 %v147_v9, %v147_v9 }
 0x118   :  { %v228_v12 = vadd.f32 %v227_v7, %v795_v6  ;;  %v241_v0 = vrot.slane %v239_v8, 4 }
 0x119   :  { %v234_v14 = vadd.f32 %v233_v10, %v147_v9  ;;  %v247_v15 = vrot.slane %v240_v11, 4  ;;  %v322_v10 = vsub.s32 3, %v801_v48 }
 0x11a   :  { %v229_v16 = vrot.slane %v228_v12, 2  ;;  %v242_v17 = vadd.f32 %v241_v0, %v239_v8  ;;  %v318_v8 = vsub.s32 1, %v801_v48 }
 0x11b   :  { %v235_v18 = vrot.slane %v234_v14, 2  ;;  %v248_v19 = vadd.f32 %v247_v15, %v240_v11 }
 0x11c   :  { %v230_v13 = vadd.f32 %v229_v16, %v228_v12  ;;  %v243_v20 = vrot.slane %v242_v17, 2 }
 0x11d   :  { %v236_v21 = vadd.f32 %v235_v18, %v234_v14  ;;  %v249_v22 = vrot.slane %v248_v19, 2 }
 0x11e   :  { %v231_v23 = vrot.slane %v230_v13, 1  ;;  %v244_v24 = vadd.f32 %v243_v20, %v242_v17 }
 0x11f   :  { %v237_v25 = vrot.slane %v236_v21, 1  ;;  %v250_v26 = vadd.f32 %v249_v22, %v248_v19 }
 0x120   :  { %v232_v27 = vadd.f32 %v231_v23, %v230_v13  ;;  %v245_v28 = vrot.slane %v244_v24, 1 }
 0x121   :  { %v238_v29 = vadd.f32 %v237_v25, %v236_v21  ;;  %v251_v30 = vrot.slane %v250_v26, 1 }
 0x122   :  { %v246_v31 = vadd.f32 %v245_v28, %v244_v24  ;;  %v253_v32 = vmul.f32 0.125, %v232_v27 }
 0x123   :  { %v252_v33 = vadd.f32 %v251_v30, %v250_v26  ;;  %v254_v34 = vmul.f32 0.125, %v238_v29 }
 0x124   :  { %v255_v35 = vmul.f32 0.125, %v246_v31  ;;  %v257_v36 = vmul.f32 %v253_v32, %v253_v32 }
 0x125   :  { %v256_v37 = vmul.f32 0.125, %v252_v33  ;;  %v258_v38 = vmul.f32 %v254_v34, %v254_v34 }
 0x126   :  { %v259_v39 = vsub.f32 %v255_v35, %v257_v36 }
 0x127   :  { %v260_v40 = vsub.f32 %v256_v37, %v258_v38 }
 0x128   :  { %v261_v41 = vmax.f32 %v259_v39, 0.0 }
 0x129   :  { %v262_v42 = vmax.f32 %v260_v40, 0.0 }
 0x12a   :  { %v263_v43 = vadd.f32 1e-05, %v261_v41 }
 0x12b   :  { %v264_v44 = vadd.f32 1e-05, %v262_v42 }
 0x12c   :  { %609 = vrsqrt.f32 %v263_v43  ;;  %v62_v43 = vld [vmem:[%s837_s4] sm:$0x7]  ;;  %s681_s4 = scalar_lea.vmem %s489_s9, 128 }
 0x12d   :  { %611 = vrsqrt.f32 %v264_v44  ;;  %v223_v44 = vrot.slane %v62_v43, %v222_v55  ;;  %p682_p10 = scmp.ne.s32.totalorder %s489_s9, %s681_s4  ;;  %p687_p12 = scmp.lt.s32.totalorder %s681_s4, %s681_s4 }
 0x12f   :  { %p688_p13 = por %p687_p12, %p686_p11 }
 0x131   :  { %p689_p0 = pnand %p688_p13, %p682_p10 }
 0x136   :  { %v610_v50 = vpop.eup %609 }
 0x137   :  { %v612_v52 = vpop.eup %611 }
 0x138   :  { %v269_v53 = vcombine.low %v610_v50, %v612_v52 }
 0x13a   :  { %v276_v56 = vrot.slane %v269_v53, %v275_v51 }
 0x13c   :  { %v278_v58 = vmul.f32 %v276_v56, %v61_v54 }
 0x13e   :  { %v283_v59 = vrot.slane %v278_v58, %v809_v57  ;;  %v287_v60 = vrot.slane %v278_v58, %v222_v55 }
 0x140   :  { %v290_v61 = vmul.f32 %v283_v59, %v253_v32  ;;  %v291_v62 = vmul.f32 %v287_v60, %v254_v34  ;;  %v312_v63 = vrot.slane %v287_v60, %v809_v57  ;;  %v308_v1 = vrot.slane %v283_v59, %v809_v57 }
 0x142   :  { %v294_v2 = vcombine.low %v290_v61, %v291_v62  ;;  %v314_v3 = vmul.f32 %v312_v63, %v147_v9  ;;  %v313_v4 = vmul.f32 %v308_v1, %v795_v6  ;;  %v216_v6 = vpop.f32.mrb[2].mxu1 }
 0x143   :  { %v550_v9 = vpop.f32.mrb[3].mxu1  ;;  %v224_v47 = vadd.f32 %v223_v44, %v216_v6 }
 0x144   :  { %v301_v5 = vrot.slane %v294_v2, %v275_v51 }
 0x145   :  { %v225_v51 = vmul.f32 0.2, %v224_v47 }
 0x146   :  { %v302_v7 = vrot.slane %v301_v5, 7 }
 0x147   :  { %v226_v56 = vmax.f32 %v224_v47, %v225_v51 }
 0x148   :  { %v304_v11 = vsub.f32 %v61_v54, %v302_v7 }
 0x14a   :  { %v323_v12 = vrot.slane %v304_v11, %v322_v10  ;;  %v319_v0 = vrot.slane %v304_v11, %v318_v8 }
 0x14c   :  { %v333_v14 = vrot.slane %v323_v12, %v318_v8  ;;  %v329_v15 = vrot.slane %v319_v0, %v318_v8 }
 0x14e   :  { %v335_v16 = vadd.f32 %v333_v14, %v314_v3  ;;  %v334_v17 = vadd.f32 %v329_v15, %v313_v4 }
 0x150   :  { %v337_v18 = vmul.f32 0.2, %v335_v16  ;;  %v336_v19 = vmul.f32 0.2, %v334_v17 }
 0x152   :  { %v339_v13 = vmax.f32 %v335_v16, %v337_v18  ;;  %v338_v20 = vmax.f32 %v334_v17, %v336_v19 }
 0x154   :  { %436 = vmatprep.mubr.f32.mxu0 %v339_v13 }
 0x155   :  { %437 = vmatmul.mubr.f32.vlgmr.msra.gmra.mrb[0].mxu0 %v338_v20 }
 0x228   :  { %v537_v21 = vpop.f32.mrb[0].mxu0 }
 0x229   :  { %v538_v22 = vpop.f32.mrb[1].mxu0 }
 0x22a   :  { %v539_v23 = vadd.f32 %v538_v22, %v537_v21 }
 0x22c   :  { %v442_v24 = vrot.slane %v539_v23, 4  ;;  %v448_v25 = vmul.f32 %v539_v23, %v539_v23 }
 0x22e   :  { %v443_v26 = vadd.f32 %v539_v23, %v442_v24  ;;  %v449_v27 = vrot.slane %v448_v25, 4 }
 0x230   :  { %v444_v28 = vrot.slane %v443_v26, 2  ;;  %v450_v29 = vadd.f32 %v449_v27, %v448_v25 }
 0x232   :  { %v445_v30 = vadd.f32 %v444_v28, %v443_v26  ;;  %v451_v31 = vrot.slane %v450_v29, 2 }
 0x234   :  { %v446_v32 = vrot.slane %v445_v30, 1  ;;  %v452_v33 = vadd.f32 %v451_v31, %v450_v29 }
 0x236   :  { %v453_v34 = vrot.slane %v452_v33, 1  ;;  %v447_v35 = vadd.f32 %v446_v32, %v445_v30 }
 0x238   :  { %v454_v36 = vadd.f32 %v453_v34, %v452_v33  ;;  %v455_v37 = vmul.f32 0.125, %v447_v35 }
 0x23a   :  { %v456_v38 = vmul.f32 0.125, %v454_v36  ;;  %v457_v39 = vmul.f32 %v455_v37, %v455_v37 }
 0x23c   :  { %v458_v40 = vsub.f32 %v456_v38, %v457_v39 }
 0x23e   :  { %v459_v41 = vmax.f32 %v458_v40, 0.0 }
 0x240   :  { %v460_v42 = vadd.f32 1e-05, %v459_v41 }
 0x242   :  { %613 = vrsqrt.f32 %v460_v42 }
 0x24c   :  { %v614_v45 = vpop.eup %613 }
 0x24d   :  { %v462_v46 = vmul.f32 %v614_v45, %v62_v43 }
 0x24f   :  { %v463_v48 = vmul.f32 %v462_v46, %v455_v37  ;;  %v471_v50 = vrot.slane %v462_v46, %v809_v57 }
 0x251   :  { %v465_v49 = vrot.slane %v463_v48, 7  ;;  %v472_v53 = vmul.f32 %v539_v23, %v471_v50 }
 0x253   :  { %v467_v52 = vsub.f32 %v62_v43, %v465_v49 }
 0x255   :  { %v476_v54 = vrot.slane %v467_v52, %v318_v8 }
 0x257   :  { %v477_v58 = vadd.f32 %v476_v54, %v472_v53 }
 0x259   :  { %v478_v59 = vadd.f32 %v477_v58, %v226_v56 }
 0x25b   :  { %v479_v60 = vmul.f32 0.2, %v478_v59 }
 0x25d   :  { %v480_v61 = vmax.f32 %v478_v59, %v479_v60 }
 0x25f   :  { %481 = vst [vmem:[#allocation8] sm:$0xff] %v480_v61 }
 0x260   :  { %692 = shalt.err (!%p689_p0)
}
 0x261   :  { %s693_s12 = scalar_lea.hbm %s838_s5, 128 }
 0x262   :  { %p694_p1 = scmp.ne.s32.totalorder %s838_s5, %s693_s12  ;;  %p697_p2 = scmp.lt.u32.totalorder %s693_s12, %s838_s5 }
 0x264   :  { %p699_p3 = pnand %p697_p2, %p694_p1 }
 0x266   :  { %702 = shalt.err (!%p699_p3)
}
 0x267   :  { %491 = dma.vmem_to_hbm [thread:$0]  %s489_s9, 128, %s838_s5, [#allocation4]  }
 0x268   :  { %707 = dma.done.wait [#allocation4], 128  }
 0x269   :  { %708 = vsyncadd [#allocation4], 4294967168 }
 0x26a   :  { %495 = vsyncpa [#allocation3], 1 }
 0x26b   :  { %496 = vsyncpa [#allocation6], 1 }
 0x26c   :  { %497 = vsyncpa [#allocation4], 1 }

</bundles_post_ra>
